<compile_context>
chip_gen: v7x
topology: tpu7x:2x2x1
jax: 0.10.0
libtpu: 0.0.40
codegen_flags: <defaults>
</compile_context>

<pallas_src>
import functools

import jax
import jax.numpy as jnp
from jax.experimental import pallas as pl
from jax.experimental.pallas import tpu as pltpu


def _round_up(x, m):
    return ((x + m - 1) // m) * m


def _vmem_capacity_bytes():
    try:
        return int(pltpu.get_tpu_info().vmem_capacity_bytes)
    except Exception:
        return 64 << 20  # assume the smallest per-TC VMEM (v7x) if query fails


def _rmsnorm_kernel(x_ref, w_ref, o_ref, *, eps, inv_e):
    # Pass 1: fp32 sum-of-squares; only the (rows, 1) reduction result,
    # not the full-tile f32 upcast, needs to stay live past this point.
    x_f32 = x_ref[...].astype(jnp.float32)
    ssq = jnp.sum(x_f32 * x_f32, axis=-1, keepdims=True)
    r_rms = jax.lax.rsqrt(ssq * inv_e + eps)  # EUP rsqrt, 1/E folded in

    # Pass 2: re-read the VMEM tile and re-cast (vld slots have ample
    # headroom at the HBM roofline; avoids keeping the f32 temp alive).
    x2_f32 = x_ref[...].astype(jnp.float32)
    # Match PyTorch exactly: (x_fp32 * r_rms).to(x.dtype) * weight(float32).
    y = (x2_f32 * r_rms).astype(x_ref.dtype)
    o_ref[...] = (y.astype(jnp.float32) * w_ref[...]).astype(o_ref.dtype)


def rmsnorm(x_BTE, weight_E, eps, *, block_rows=None, out_dtype=None):
    B, T, E = x_BTE.shape
    N = B * T

    # PyTorch promotion: x.dtype * float32 weight -> promoted dtype.
    # Pass out_dtype=x_BTE.dtype explicitly when the consumer accepts the
    # narrow dtype (halves output HBM traffic for bf16 activations).
    if out_dtype is None:
        out_dtype = jnp.promote_types(x_BTE.dtype, jnp.float32)

    x2d = x_BTE.reshape(N, E)
    w2d = weight_E.reshape(1, E).astype(jnp.float32)

    # Lane-dense guard: pad E up to a multiple of 128 (zeros contribute 0 to
    # the sum-of-squares; inv_e stays 1/E so the mean is unchanged).
    E_pad = _round_up(E, 128)
    if E_pad != E:
        x2d = jnp.pad(x2d, ((0, 0), (0, E_pad - E)))
        w2d = jnp.pad(w2d, ((0, 0), (0, E_pad - E)))

    in_bytes = jnp.dtype(x_BTE.dtype).itemsize
    out_bytes = jnp.dtype(out_dtype).itemsize

    # Sublane packing: 8 rows/vreg for 32-bit, 16 for bf16, 32 for 8-bit.
    pack = 8 * max(1, 4 // in_bytes)

    vmem_capacity = _vmem_capacity_bytes()
    # Per-row VMEM cost: double-buffered in/out pipeline buffers plus the
    # in-kernel f32 temporaries (squared term + recast), conservatively.
    bytes_per_row = E_pad * (in_bytes + out_bytes) * 2 + 2 * E_pad * 4

    if block_rows is None:
        if vmem_capacity <= (64 << 20):       # v7x-class: 64 MiB per TC
            vmem_budget = 24 * 1024 * 1024
            target_rows = 512
        else:                                  # v5e/v6e-class: 128 MiB
            vmem_budget = 64 * 1024 * 1024
            target_rows = 1024
        cap = max(pack, (vmem_budget // bytes_per_row) // pack * pack)
        block_rows = min(target_rows, cap)

    # Guarantee >=2 grid steps when possible (v7x megacore + DMA overlap).
    block_rows = min(block_rows, _round_up(pl.cdiv(N, 2), pack))
    # Keep the tile a sublane-pack multiple and never (much) larger than N.
    block_rows = max(pack, min(block_rows, _round_up(N, pack)))
    block_rows = _round_up(block_rows, pack)

    grid = (pl.cdiv(N, block_rows),)  # partial last block is masked by Pallas

    # Scoped VMEM sized to the actual working set (+ headroom), capped to
    # stay within the physical VMEM of the running part.
    working_set = block_rows * bytes_per_row + 2 * E_pad * 4
    vmem_limit = working_set + (4 << 20)
    vmem_limit = max(16 << 20, min(vmem_limit, int(vmem_capacity * 0.8)))

    out2d = pl.pallas_call(
        functools.partial(_rmsnorm_kernel, eps=float(eps), inv_e=1.0 / float(E)),
        out_shape=jax.ShapeDtypeStruct((N, E_pad), out_dtype),
        grid_spec=pltpu.PrefetchScalarGridSpec(
            num_scalar_prefetch=0,
            grid=grid,
            in_specs=[
                pl.BlockSpec((block_rows, E_pad), lambda i: (i, 0)),
                pl.BlockSpec((1, E_pad), lambda i: (0, 0)),
            ],
            out_specs=pl.BlockSpec((block_rows, E_pad), lambda i: (i, 0)),
        ),
        compiler_params=pltpu.CompilerParams(
            dimension_semantics=("parallel",),  # shard rows across v7x's 2 TCs
            vmem_limit_bytes=int(vmem_limit),
        ),
    )(x2d, w2d)

    if E_pad != E:
        out2d = out2d[:, :E]
    return out2d.reshape(B, T, E)


def rmsnorm_ref(x_BTE, weight_E, eps):
    x_f32 = x_BTE.astype(jnp.float32)
    r_rms = jax.lax.rsqrt(jnp.mean(x_f32 * x_f32, axis=-1, keepdims=True) + eps)
    y = (x_f32 * r_rms).astype(x_BTE.dtype)
    return y.astype(jnp.float32) * weight_E.astype(jnp.float32)


if __name__ == "__main__":
    eps = 1e-5
    key = jax.random.PRNGKey(0)

    # Test 1: f32 activations, lane-dense E (multiple of 128).
    B, T, E = 2, 8, 128
    x = jax.random.normal(key, (B, T, E), dtype=jnp.float32)
    weight = jnp.ones((E,), dtype=jnp.float32)  # nn.Parameter(torch.ones(d_embd))
    y = rmsnorm(x, weight, eps)
    jax.block_until_ready(y)
    y_ref = rmsnorm_ref(x, weight, eps)
    assert y.shape == (B, T, E)
    assert jnp.allclose(y, y_ref, atol=1e-5, rtol=1e-5)

    # Test 2: bf16 activations (16-row sublane pack) + ragged B*T
    # (exercises the cdiv grid / masked partial final tile + >=2 grid steps).
    B2, T2, E2 = 2, 9, 128
    k1, k2 = jax.random.split(key)
    x2 = jax.random.normal(k1, (B2, T2, E2), dtype=jnp.float32).astype(jnp.bfloat16)
    w2 = jnp.ones((E2,), dtype=jnp.float32)
    y2 = rmsnorm(x2, w2, eps)
    jax.block_until_ready(y2)
    y2_ref = rmsnorm_ref(x2, w2, eps)
    assert y2.shape == (B2, T2, E2)
    assert y2.dtype == jnp.float32  # PyTorch promotion with f32 weight
    assert jnp.allclose(y2, y2_ref, atol=2e-2, rtol=2e-2)

    # Test 3: narrow-output path (bf16 in / bf16 out) — the big HBM-BW lever
    # when the consumer accepts the narrow dtype.
    y3 = rmsnorm(x2, w2, eps, out_dtype=jnp.bfloat16)
    jax.block_until_ready(y3)
    assert y3.dtype == jnp.bfloat16
    assert jnp.allclose(
        y3.astype(jnp.float32), y2_ref, atol=4e-2, rtol=4e-2
    )

    print("KERNEL_OK")
</pallas_src>

<mosaic_0001>
module attributes {stable_mosaic.version = 11 : i64} {
  func.func @_rmsnorm_kernel(%arg0: i32, %arg1: memref<8x128xf32, #tpu.memory_space<vmem>>, %arg2: memref<1x128xf32, #tpu.memory_space<vmem>>, %arg3: memref<8x128xf32, #tpu.memory_space<vmem>>) attributes {dimension_semantics = [#tpu.dimension_semantics<parallel>], iteration_bounds = array<i64: 2>, scalar_prefetch = 0 : i64, scratch_operands = 0 : i64, tpu.core_type = #tpu.core_type<tc>, window_params = [{transform_indices = @transform_0, window_bounds = array<i64: 8, 128>}, {pipeline_mode = #tpu.pipeline_mode<synchronous>, transform_indices = @transform_1, window_bounds = array<i64: 1, 128>}, {transform_indices = @transform_2, window_bounds = array<i64: 8, 128>}]} {
    %c0 = arith.constant 0 : index
    %c0_0 = arith.constant 0 : index
    %0 = vector.load %arg1[%c0, %c0_0] : memref<8x128xf32, #tpu.memory_space<vmem>>, vector<8x128xf32>
    %1 = arith.mulf %0, %0 : vector<8x128xf32>
    %cst = arith.constant dense<0.000000e+00> : vector<8xf32>
    %2 = vector.multi_reduction <add>, %1, %cst [1] : vector<8x128xf32> to vector<8xf32>
    %3 = vector.shape_cast %2 : vector<8xf32> to vector<8x1xf32>
    %cst_1 = arith.constant 7.812500e-03 : f32
    %4 = vector.broadcast %cst_1 : f32 to vector<8x1xf32>
    %5 = arith.mulf %3, %4 : vector<8x1xf32>
    %cst_2 = arith.constant 9.99999974E-6 : f32
    %6 = vector.broadcast %cst_2 : f32 to vector<8x1xf32>
    %7 = arith.addf %5, %6 : vector<8x1xf32>
    %8 = math.rsqrt %7 : vector<8x1xf32>
    %c0_3 = arith.constant 0 : index
    %c0_4 = arith.constant 0 : index
    %9 = vector.load %arg1[%c0_3, %c0_4] : memref<8x128xf32, #tpu.memory_space<vmem>>, vector<8x128xf32>
    %10 = vector.broadcast %8 : vector<8x1xf32> to vector<8x128xf32>
    %11 = arith.mulf %9, %10 : vector<8x128xf32>
    %c0_5 = arith.constant 0 : index
    %c0_6 = arith.constant 0 : index
    %12 = vector.load %arg2[%c0_5, %c0_6] : memref<1x128xf32, #tpu.memory_space<vmem>>, vector<1x128xf32>
    %13 = vector.broadcast %12 : vector<1x128xf32> to vector<8x128xf32>
    %14 = arith.mulf %11, %13 : vector<8x128xf32>
    %c0_7 = arith.constant 0 : index
    %c0_8 = arith.constant 0 : index
    %15 = vector.load %arg3[%c0_7, %c0_8] : memref<8x128xf32, #tpu.memory_space<vmem>>, vector<8x128xf32>
    tpu.vector_store %arg3[%c0_7, %c0_8], %14 {strides = array<i32>} : memref<8x128xf32, #tpu.memory_space<vmem>>, vector<8x128xf32>,
    return
  }
  func.func @transform_0(%arg0: i32) -> (i32, i32) {
    %c0_i32 = arith.constant 0 : i32
    %c0_i32_0 = arith.constant 0 : i32
    return %arg0, %c0_i32 : i32, i32
  }
  func.func @transform_1(%arg0: i32) -> (i32, i32) {
    %c0_i32 = arith.constant 0 : i32
    %c0_i32_0 = arith.constant 0 : i32
    %c0_i32_1 = arith.constant 0 : i32
    return %c0_i32, %c0_i32_0 : i32, i32
  }
  func.func @transform_2(%arg0: i32) -> (i32, i32) {
    %c0_i32 = arith.constant 0 : i32
    %c0_i32_0 = arith.constant 0 : i32
    return %arg0, %c0_i32 : i32, i32
  }
}

</mosaic_0001>

<bundles_post_ra>
// kernel: tpu_custom_call.1
= control target key start
LH: loop header
LB: loop body
LE: loop exit
PB: predicated region body
PF: predicated region fallthrough
CT: control target
= control target key end

     0   :  { %7 = vsyncpa [#allocation3], 0  ;;  %s600_s0 = inlined_call_operand.hbm [shape: f32[16,128], index: 0, kind: input, shape index: {}]   ;;  %s601_s1 = inlined_call_operand.vmem [shape: f32[1,128], index: 1, kind: input, shape index: {}]   ;;  %s602_s2 = inlined_call_operand.hbm [shape: f32[16,128], index: 2, kind: output, shape index: {}]  }
   0x1   :  { %9 = vsyncpa [#allocation3 + $0x1], 0 }
   0x2   :  { %10 = vsyncpa [#allocation4], 0 }
   0x3   :  { %12 = vsyncpa [#allocation4 + $0x1], 0  ;;  %s436_s9 = smov 0   ;;  %s438_s10 = smov 0  }
   0x4   :  { %s440_s11 = smov 0   ;;  %s442_s12 = smov 0  }
   0x5 LB: > { %s457_s13 = sadd.s32 4294967295, %s417_s12   ;;  %s260_s14 = sadd.s32 4294967294, %s417_s12   ;;  %s417_s12 = sphi %s442_s12, %s617_s12   ;;  %s413_s11 = sphi %s440_s11, %s616_s11   ;;  %s409_s10 = sphi %s438_s10, %s615_s10   ;;  %s405_s9 = sphi %s436_s9, %s614_s9  }
   0x6   : > { %s461_s15 = sadd.s32 1, %s417_s12   ;;  %s25_s16 = sadd.s32 1, %s413_s11 }
   0x7   : > { %s22_s17 = ssub.s32 %s417_s12, %s461_s15  ;;  %p32_p0 = scmp.ne.s32.totalorder %s413_s11, %s409_s10 }
   0x8   : > { %p23_p1 = scmp.eq.s32.totalorder %s22_s17, 0  ;;  %p33_p2 = scmp.eq.s32.totalorder %s417_s12, 0 }
   0x9   : > { %p38_p3 = scmp.ne.s32.totalorder %s409_s10, %s405_s9  ;;  %p39_p4 = scmp.eq.s32.totalorder %s457_s13, 0 }
   0xa   : > { %s473_s18 = scalar_select %p23_p1, %s413_s11, %s25_s16  }
   0xb   : > { %p475_p5 = por %p33_p2, %p32_p0  ;;  %p479_p6 = por %p39_p4, %p38_p3 }
   0xc   : > { %p83_p7 = scmp.eq.s32.totalorder %s457_s13, 1  ;;  %p89_p8 = scmp.eq.s32.totalorder %s260_s14, 1 }
   0xd   : > { %p285_p10 = scmp.lt.s32.totalorder %s417_s12, 2  ;;  %s112_s23 = sand.u32 1, %s413_s11  }
   0xe   : > { %p486_p11 = por %p83_p7, %p32_p0  ;;  %p490_p12 = por %p89_p8, %p38_p3 }
   0xf   : > { %s264_s24 = sshll.u32 %s417_s12, 7  ;;  %s263_s25 = sshll.u32 %s112_s23, 3 }
  0x10   : > { %s606_s21 = scalar_select %p486_p11, 1, 0 }
  0x11   : > { %s607_s22 = scalar_select %p490_p12, 1, 0 }
  0x12   : > { %s499_s28 = scalar_lea.hbm %s600_s0, %s264_s24  ;;  %s116_s29 = scalar_lea.vmem [#allocation2], %s263_s25 }
  0x13   : > { %s123_s30 = sshll.u32 %s116_s29, 4  ;;  %p503_p13 = pnand %p285_p10, %p475_p5  ;;  %s507_s30 = int_to_ptr.vmem [resolvable:$true] %s123_s30 }
  0x14   : > { %s113_s4 = scalar_lea.sflag [#allocation3], %s112_s23  ;;  %s321_s5 = scalar_lea.hbm %s499_s28, 128 }
  0x15   : > { %p322_p2 = scmp.ne.s32.totalorder %s499_s28, %s321_s5  ;;  %p323_p3 = pneg %p503_p13 }
  0x16   : > { %s326_s8 = scalar_lea.hbm %s600_s0, 256  ;;  %p327_p5 = scmp.lt.u32.totalorder %s499_s28, %s600_s0 }
  0x17   : > { %p324_p4 = pnand %p323_p3, %p322_p2  ;;  %p328_p8 = scmp.lt.u32.totalorder %s326_s8, %s321_s5 }
  0x18   : > { %p330_p9 = scmp.lt.u32.totalorder %s321_s5, %s499_s28 }
  0x19   : > { %p325_p7 = pneg %p324_p4  ;;  %p329_p10 = por %p328_p8, %p327_p5 }
  0x1b   : > { %p331_p0 = por %p330_p9, %p329_p10 }
  0x1d   : > { %p332_p1 = pnand %p331_p0, %p325_p7 }
  0x1f   : > { %335 = shalt.err (!%p332_p1)
}
  0x20   : > { %s336_s17 = scalar_lea.vmem %s507_s30, 128  ;;  %s419_s19 = smov [#allocation2]  }
  0x21   : > { %p337_p2 = scmp.ne.s32.totalorder %s507_s30, %s336_s17  ;;  %s341_s23 = sshll.u32 %s419_s19, 4  ;;  %s342_s23 = int_to_ptr.vmem [resolvable:$false] %s341_s23 }
  0x22   : > { %s343_s24 = scalar_lea.vmem %s342_s23, 256  ;;  %p344_p11 = scmp.lt.s32.totalorder %s507_s30, %s342_s23 }
  0x23   : > { %p339_p4 = pnand %p337_p2, %p323_p3  ;;  %p345_p5 = scmp.lt.s32.totalorder %s343_s24, %s336_s17 }
  0x25   : > { %p340_p12 = pneg %p339_p4  ;;  %p346_p8 = por %p345_p5, %p344_p11 }
  0x27   : > { %p347_p9 = pnand %p346_p8, %p340_p12 }
  0x29   : > { %350 = shalt.err (!%p347_p9)
}
  0x2a   : > { %280 = dma.hbm_to_vmem [thread:$0]  (!%p503_p13), %s499_s28, 128, %s507_s30, %s113_s4  }
  0x2b   : > { %p609_p0 = scmp.lt.s32.totalorder %s417_s12, 3  ;;  %p610_p1 = scmp.ge.s32.totalorder %s417_s12, 1 }
  0x2d   : > { %p129_p3 = pnand %p610_p1, %p609_p0 }
  0x2e   : > { %s541_s25 = sand.u32 (!%p129_p3), 1, %s409_s10  }
  0x2f   : > { %132 = sbr.rel (%p129_p3) target bundleno = 233 (0xe9), region = 28  ;;  %s266_s26 = sshll.u32 (!%p129_p3), %s541_s25, 3 }
  0x30   : > { %s135_s27 = scalar_lea.sflag (!%p129_p3), [#allocation3], %s541_s25  ;;  %s138_s29 = scalar_lea.vmem (!%p129_p3), [#allocation2], %s266_s26 }
  0x36   : > { %396 = dma.done.wait (%p479_p6), %s135_s27, 128  }
  0x37   : > { %398 = vsyncadd (%p479_p6), %s135_s27, 4294967168  ;;  %v159_v0 = vld [vmem:[%s138_s29] sm:$0xff]  ;;  %s270_s3 = sshll.u32 %s457_s13, 7  ;;  %s158_s4 = scalar_lea.vmem [#allocation5], %s266_s26 }
  0x38   : > { %v160_v1 = vmul.f32 %v159_v0, %v159_v0  ;;  %v268_v6 = vld [vmem:[%s601_s1] ss:$0 sm:$0xff]  ;;  %s190_s5 = sshll.u32 %s158_s4, 4  ;;  %s556_s7 = scalar_lea.hbm %s602_s2, %s270_s3  ;;  %s558_s5 = int_to_ptr.vmem [resolvable:$true] %s190_s5 }
  0x39   : > { %s177_s8 = scalar_lea.sflag [#allocation4], %s541_s25  ;;  %s351_s14 = scalar_lea.vmem %s558_s5, 128 }
  0x3a   : > { %161 = vadd.xlane.f32.xlu0 %v160_v1  ;;  %p352_p6 = scmp.ne.s32.totalorder %s558_s5, %s351_s14  ;;  %p611_p11 = scmp.ne.s32.totalorder %s606_s21, 0 }
  0x3b   : > { %s420_s13 = smov [#allocation5]  }
  0x3c   : > { %p353_p12 = pnand %p352_p6, %p611_p11  ;;  %s355_s16 = sshll.u32 %s420_s13, 4  ;;  %s356_s16 = int_to_ptr.vmem [resolvable:$false] %s355_s16 }
  0x3d   : > { %s357_s17 = scalar_lea.vmem %s356_s16, 256  ;;  %p358_p7 = scmp.lt.s32.totalorder %s558_s5, %s356_s16 }
  0x3e   : > { %p354_p13 = pneg %p353_p12  ;;  %p359_p10 = scmp.lt.s32.totalorder %s357_s17, %s351_s14 }
  0x40   : > { %p360_p2 = por %p359_p10, %p358_p7 }
  0x42   : > { %p361_p4 = pnand %p360_p2, %p354_p13 }
  0xc7   : > { %v162_v2 = vpop.xlane.xlu0 %161 }
  0xc8   : > { %v163_v3 = vmul.f32 0.0078125, %v162_v2 }
  0xca   : > { %v164_v4 = vadd.f32 1e-05, %v163_v3 }
  0xcc   : > { %319 = vrsqrt.f32 %v164_v4 }
  0xd6   : > { %v320_v5 = vpop.eup %319 }
  0xd7   : > { %v166_v7 = vmul.f32 %v320_v5, %v159_v0 }
  0xd9   : > { %v174_v8 = vmul.f32 %v268_v6, %v166_v7 }
  0xdb   : > { %175 = vst [vmem:[%s158_s4] sm:$0xff] %v174_v8 }
  0xdc   : > { %364 = shalt.err (!%p361_p4)
}
  0xdd   : > { %s365_s19 = scalar_lea.hbm %s556_s7, 128  ;;  %s369_s25 = scalar_lea.hbm %s602_s2, 256 }
  0xde   : > { %p366_p5 = scmp.ne.s32.totalorder %s556_s7, %s365_s19  ;;  %p370_p0 = scmp.lt.u32.totalorder %s556_s7, %s602_s2 }
  0xdf   : > { %p371_p1 = scmp.lt.u32.totalorder %s369_s25, %s365_s19  ;;  %p373_p6 = scmp.lt.u32.totalorder %s365_s19, %s556_s7 }
  0xe0   : > { %p367_p8 = pnand %p366_p5, %p611_p11 }
  0xe1   : > { %p372_p3 = por %p371_p1, %p370_p0 }
  0xe2   : > { %p368_p9 = pneg %p367_p8 }
  0xe3   : > { %p374_p12 = por %p373_p6, %p372_p3 }
  0xe5   : > { %p375_p13 = pnand %p374_p12, %p368_p9 }
  0xe7   : > { %378 = shalt.err (!%p375_p13)
}
  0xe8   : > { %275 = dma.vmem_to_hbm [thread:$0]  (%p611_p11), %s558_s5, 128, %s556_s7, %s177_s8  }
  0xe9 PF: > { %s202_s29 = sand.u32 1, %s405_s9   ;;  %p612_p7 = scmp.ne.s32.totalorder %s607_s22, 0 }
  0xea   : > { %p613_p10 = scmp.ge.s32.totalorder %s417_s12, 2  ;;  %s203_s28 = scalar_lea.sflag [#allocation4], %s202_s29 }
  0xec   : > { %p282_p2 = pnand %p613_p10, %p612_p7 }
  0xee   : > { %400 = dma.done.wait (!%p282_p2), %s203_s28, 128  }
  0xef   : > { %402 = vsyncadd (!%p282_p2), %s203_s28, 4294967168  ;;  %p15_p4 = scmp.ge.s32.totalorder %s461_s15, 4   ;;  %s614_s9 = smov %s409_s10 }
  0xf0   : > { %s615_s10 = smov %s413_s11  ;;  %s616_s11 = smov %s473_s18 }
  0xf1   : > { %s617_s12 = smov %s461_s15  ;;  %17 = sbr.rel (!%p15_p4) target bundleno = 5 (0x5), region = 73 }
  0xf8   :  { %208 = vsyncpa [#allocation3], 1 }
  0xf9   :  { %210 = vsyncpa [#allocation3 + $0x1], 1 }
  0xfa   :  { %211 = vsyncpa [#allocation4], 1 }
  0xfb   :  { %213 = vsyncpa [#allocation4 + $0x1], 1 }

</bundles_post_ra>
